<compile_context>
chip_gen: v7x
topology: tpu7x:2x2x1
jax: 0.10.0
libtpu: 0.0.40
codegen_flags: <defaults>
</compile_context>

<pallas_src>
import functools
import math

import jax
import jax.numpy as jnp
from jax.experimental import pallas as pl
from jax.experimental.pallas import tpu as pltpu


def _attn_layer(x, bias, row_mask, w_ref, b_ref, d_out):
    """One TransformerConv: fused QKVS projection, masked softmax, aggregation, skip.

    x:        (N, D_in) activations (any float dtype; cast to bf16 for the MXU)
    bias:     (N, N) f32 additive mask, 0 on edges / -1e30 elsewhere (shared by layers)
    row_mask: (N, 1) f32, 1 where the node has >=1 incoming edge else 0
    """
    xb = x.astype(jnp.bfloat16)
    # Fused [q|k|v|skip] projection: one wide MXU matmul instead of four lane-starved ones.
    qkvs = jnp.dot(xb, w_ref[...], preferred_element_type=jnp.float32) + b_ref[...]
    scale = 1.0 / math.sqrt(d_out)
    q = (qkvs[:, 0 * d_out:1 * d_out] * scale).astype(jnp.bfloat16)   # fold 1/sqrt(d) into q
    k = qkvs[:, 1 * d_out:2 * d_out].astype(jnp.bfloat16)
    v = qkvs[:, 2 * d_out:3 * d_out].astype(jnp.bfloat16)
    skip = qkvs[:, 3 * d_out:4 * d_out]

    # scores[i, j] = (q_i . k_j); contraction on last dims -> no transpose.
    scores = jax.lax.dot_general(q, k, (((1,), (1,)), ((), ())),
                                 preferred_element_type=jnp.float32)

    # Masked softmax over incoming neighbours (f32). Non-edges carry -1e30, so their
    # exp underflows to 0; the max entry of a row with edges contributes exp(0)=1, so
    # denom >= 1 always and the approximate reciprocal is safe.
    masked = scores + bias
    m = jnp.max(masked, axis=-1, keepdims=True)
    p = jnp.exp(masked - m)
    denom = jnp.sum(p, axis=-1, keepdims=True)
    alpha = (p * pl.reciprocal(denom, approx=True)).astype(jnp.bfloat16)

    aggr = jnp.dot(alpha, v, preferred_element_type=jnp.float32)
    # Rows with no incoming edge would otherwise see a spurious uniform 1/N average
    # (all-masked row -> p == 1 everywhere); zero their aggregation so they get skip only.
    return aggr * row_mask + skip


def _img_contrast_kernel(x_ref, adj_ref,
                         w1_ref, b1_ref, w2_ref, b2_ref, w3_ref, b3_ref,
                         out_ref, *, num_hidden, out_dim, ncluster):
    branch = pl.program_id(0)                       # 0 -> xi branch, 1 -> xj branch
    n = x_ref.shape[0]

    # Adjacency-derived quantities, built ONCE per branch and shared by all 3 layers.
    adj_f = adj_ref[...].astype(jnp.float32)        # (N, N) 0/1, adj[i, j]=1 iff edge j->i
    bias = jnp.where(adj_f > 0, jnp.float32(0.0), jnp.float32(-1e30))      # (N, N) f32
    row_mask = (jnp.max(adj_f, axis=-1, keepdims=True) > 0).astype(jnp.float32)  # (N, 1)

    x = x_ref[...]                                  # (N, D_in) bf16

    # conv1 + ELU (h1 lives entirely in VMEM, never written back to HBM)
    h1 = _attn_layer(x, bias, row_mask, w1_ref, b1_ref, num_hidden)
    h1 = jnp.where(h1 > 0, h1, jnp.exp(jnp.minimum(h1, 0.0)) - 1.0)

    # conv2
    h2 = _attn_layer(h1, bias, row_mask, w2_ref, b2_ref, out_dim)

    # proj: ci = proj(hi1), cj = proj(hj2)  (asymmetric, exactly as in the reference forward);
    # scalar-predicate select -> no (N, D) index/mask arrays (valid because num_hidden == out_dim).
    proj_in = jnp.where(branch == 0, h1, h2)
    c = _attn_layer(proj_in, bias, row_mask, w3_ref, b3_ref, ncluster)

    # Lane-dense combined output: [h2 | c | zero-pad] as one 128-wide slab -> one
    # unmasked full-width store + a single output DMA per branch.
    pad = out_ref.shape[-1] - (out_dim + ncluster)
    pieces = [h2, c]
    if pad:
        pieces.append(jnp.zeros((n, pad), jnp.float32))
    out_ref[...] = jnp.concatenate(pieces, axis=-1).astype(out_ref.dtype)


def _cost_estimate(n, d_in, num_hidden, out_dim, ncluster, out_pad):
    def layer_flops(di, do):
        return 2 * n * di * 4 * do + 2 * (2 * n * n * do)   # fused proj + scores + aggregate
    flops = 2 * (layer_flops(d_in, num_hidden)
                 + layer_flops(num_hidden, out_dim)
                 + layer_flops(out_dim, ncluster))
    transcendentals = 2 * (3 * n * n + n * num_hidden)      # softmax exp per layer + ELU
    w_bytes = 2 * 4 * (d_in * num_hidden + num_hidden * out_dim + out_dim * ncluster)  # bf16
    b_bytes = 4 * 4 * (num_hidden + out_dim + ncluster)
    bytes_accessed = (2 * n * d_in * 2            # stacked x (bf16)
                      + n * n * 2                 # adj (bf16)
                      + w_bytes + b_bytes
                      + 2 * n * out_pad * 4)      # combined padded output (f32)
    return pl.CostEstimate(flops=flops, transcendentals=transcendentals,
                           bytes_accessed=bytes_accessed)


def _vmem_limit_bytes(n, d_in, num_hidden, out_dim, ncluster, out_pad):
    """Scoped-VMEM request derived from N (default 16/32 MiB is the hidden ceiling)."""
    nn = n * n
    adj_bytes = 2 * 2 * nn + 4 * nn       # bf16 adj (double-buffered) + resident f32 bias
    attn_bytes = 2 * 4 * nn               # largest live (N,N) f32 intermediates (scores, p)
    dmax = max(d_in, 4 * num_hidden, 4 * out_dim, 4 * ncluster, out_pad)
    act_bytes = 8 * n * dmax * 4          # activations / fused projections / outputs (generous)
    need = adj_bytes + attn_bytes + act_bytes + (4 << 20)
    # Cap below v5e/v6e physical VMEM; at toy N this floors at the 32 MiB default.
    return int(min(96 << 20, max(32 << 20, need)))


@functools.partial(jax.jit, static_argnames=("num_hidden", "out_dim", "ncluster"))
def img_contrast_forward(xi, xj, adj, w1, b1, w2, b2, w3, b3, *,
                         num_hidden, out_dim, ncluster):
    n, d_in = xi.shape
    # bf16 x: it is only ever consumed by a bf16 MXU matmul -> half the input DMA bytes.
    x = jnp.stack([xi, xj], axis=0).astype(jnp.bfloat16)     # (2, N, D_in)
    adj_bf16 = adj.astype(jnp.bfloat16)                      # 0/1 mask, half the DMA bytes

    out_pad = -(-(out_dim + ncluster) // 128) * 128          # lane-dense padded output width

    kernel = functools.partial(_img_contrast_kernel,
                               num_hidden=num_hidden, out_dim=out_dim, ncluster=ncluster)

    def full(shape):
        # Constant index_map across the grid -> the pipeliner does not re-fetch these
        # between the two branch steps.
        return pl.BlockSpec(shape, lambda b: (0,) * len(shape))

    def per_branch(shape):
        # leading branch dim is squeezed out of the kernel Ref
        return pl.BlockSpec((None,) + shape, lambda b: (b, 0, 0))

    out = pl.pallas_call(
        kernel,
        out_shape=jax.ShapeDtypeStruct((2, n, out_pad), jnp.float32),
        grid=(2,),                                           # branch axis: xi / xj
        in_specs=[per_branch((n, d_in)),                     # x, branch-sliced
                  full((n, n)),                              # adj, shared by both branches
                  full(w1.shape), full(b1.shape),
                  full(w2.shape), full(b2.shape),
                  full(w3.shape), full(b3.shape)],
        out_specs=per_branch((n, out_pad)),
        compiler_params=pltpu.CompilerParams(
            dimension_semantics=("parallel",),
            vmem_limit_bytes=_vmem_limit_bytes(n, d_in, num_hidden, out_dim,
                                               ncluster, out_pad)),
        cost_estimate=_cost_estimate(n, d_in, num_hidden, out_dim, ncluster, out_pad),
    )(x, adj_bf16, w1, b1, w2, b2, w3, b3)

    h2 = out[:, :, :out_dim]
    c = out[:, :, out_dim:out_dim + ncluster]
    return h2[0], h2[1], c[0], c[1]


def init_fused_conv_params(key, d_in, d_out):
    """Fused TransformerConv params: W (d_in, 4*d_out) bf16 = [Wq|Wk|Wv|Wskip], b (1, 4*d_out) f32."""
    kw, kb = jax.random.split(key)
    w = jax.random.normal(kw, (d_in, 4 * d_out), jnp.float32) * (1.0 / math.sqrt(d_in))
    b = jax.random.normal(kb, (1, 4 * d_out), jnp.float32) * 0.02
    return w.astype(jnp.bfloat16), b


class ImgContrastPallas:
    def __init__(self, hidden_dims, ncluster, key):
        in_dim, img_dim, num_hidden, out_dim = hidden_dims   # in_dim unused (as in the reference)
        # The reference applies `proj` (built with in_channels=out_dim) to hi1 which has
        # num_hidden features; only well-defined when num_hidden == out_dim.
        assert num_hidden == out_dim, "reference `proj(hi1)` requires num_hidden == out_dim"
        k1, k2, k3 = jax.random.split(key, 3)
        self.w1, self.b1 = init_fused_conv_params(k1, img_dim, num_hidden)
        self.w2, self.b2 = init_fused_conv_params(k2, num_hidden, out_dim)
        self.w3, self.b3 = init_fused_conv_params(k3, out_dim, ncluster)
        self.num_hidden, self.out_dim, self.ncluster = num_hidden, out_dim, ncluster

    def __call__(self, xi, xj, adj):
        # TODO(synk): reference `self.imgconv(hj1, ...)` is an attribute typo (would raise in
        # PyTorch); interpreted as `self.imgconv2`, which matches the symmetric branch.
        return img_contrast_forward(
            xi, xj, adj,
            self.w1, self.b1, self.w2, self.b2, self.w3, self.b3,
            num_hidden=self.num_hidden, out_dim=self.out_dim, ncluster=self.ncluster)


def edge_index_to_adj(edge_index, num_nodes):
    """Dense 0/1 mask: adj[dst, src] = 1 for every edge src -> dst (bf16 — the only O(N^2) input)."""
    src, dst = edge_index[0], edge_index[1]
    adj = jnp.zeros((num_nodes, num_nodes), jnp.float32)
    return adj.at[dst, src].set(1.0).astype(jnp.bfloat16)


if __name__ == "__main__":
    key = jax.random.PRNGKey(0)
    k_params, k_xi, k_xj = jax.random.split(key, 3)

    # small shapes: N nodes, hidden_dims = [in_dim, img_dim, num_hidden, out_dim]
    N = 16
    hidden_dims = [8, 8, 32, 32]   # num_hidden == out_dim (required by the `proj(hi1)` call)
    ncluster = 8

    xi = jax.random.normal(k_xi, (N, hidden_dims[1]), jnp.float32)
    xj = jax.random.normal(k_xj, (N, hidden_dims[1]), jnp.float32)

    # deterministic, duplicate-free edge list: each node i receives edges from
    # (i+1)%N, (i+3)%N, (i+7)%N  ->  edge_index shape (2, 3N)
    dst = jnp.repeat(jnp.arange(N), 3)
    src = jnp.stack([(jnp.arange(N) + 1) % N,
                     (jnp.arange(N) + 3) % N,
                     (jnp.arange(N) + 7) % N], axis=1).reshape(-1)
    edge_index = jnp.stack([src, dst], axis=0).astype(jnp.int32)   # (2, 48)

    adj = edge_index_to_adj(edge_index, N)

    model = ImgContrastPallas(hidden_dims, ncluster, k_params)
    hi2, hj2, ci, cj = model(xi, xj, adj)
    jax.block_until_ready((hi2, hj2, ci, cj))

    assert hi2.shape == (N, hidden_dims[3])
    assert hj2.shape == (N, hidden_dims[3])
    assert ci.shape == (N, ncluster)
    assert cj.shape == (N, ncluster)
    assert all(bool(jnp.all(jnp.isfinite(t))) for t in (hi2, hj2, ci, cj))

    print("KERNEL_OK")
</pallas_src>

<mosaic_0001>
module attributes {stable_mosaic.version = 11 : i64} {
  func.func @_img_contrast_kernel(%arg0: i32, %arg1: memref<1x16x8xbf16, #tpu.memory_space<vmem>>, %arg2: memref<16x16xbf16, #tpu.memory_space<vmem>>, %arg3: memref<8x128xbf16, #tpu.memory_space<vmem>>, %arg4: memref<1x128xf32, #tpu.memory_space<vmem>>, %arg5: memref<32x128xbf16, #tpu.memory_space<vmem>>, %arg6: memref<1x128xf32, #tpu.memory_space<vmem>>, %arg7: memref<32x32xbf16, #tpu.memory_space<vmem>>, %arg8: memref<1x32xf32, #tpu.memory_space<vmem>>, %arg9: memref<1x16x128xf32, #tpu.memory_space<vmem>>) attributes {dimension_semantics = [#tpu.dimension_semantics<parallel>], iteration_bounds = array<i64: 2>, scalar_prefetch = 0 : i64, scratch_operands = 0 : i64, tpu.core_type = #tpu.core_type<tc>, window_params = [{transform_indices = @transform_0, window_bounds = array<i64: 1, 16, 8>}, {pipeline_mode = #tpu.pipeline_mode<synchronous>, transform_indices = @transform_1, window_bounds = array<i64: 16, 16>}, {pipeline_mode = #tpu.pipeline_mode<synchronous>, transform_indices = @transform_2, window_bounds = array<i64: 8, 128>}, {pipeline_mode = #tpu.pipeline_mode<synchronous>, transform_indices = @transform_3, window_bounds = array<i64: 1, 128>}, {pipeline_mode = #tpu.pipeline_mode<synchronous>, transform_indices = @transform_4, window_bounds = array<i64: 32, 128>}, {pipeline_mode = #tpu.pipeline_mode<synchronous>, transform_indices = @transform_5, window_bounds = array<i64: 1, 128>}, {pipeline_mode = #tpu.pipeline_mode<synchronous>, transform_indices = @transform_6, window_bounds = array<i64: 32, 32>}, {pipeline_mode = #tpu.pipeline_mode<synchronous>, transform_indices = @transform_7, window_bounds = array<i64: 1, 32>}, {transform_indices = @transform_8, window_bounds = array<i64: 1, 16, 128>}]} {
    %c0 = arith.constant 0 : index
    %c0_0 = arith.constant 0 : index
    %0 = vector.load %arg2[%c0, %c0_0] : memref<16x16xbf16, #tpu.memory_space<vmem>>, vector<16x16xbf16>
    %1 = arith.extf %0 : vector<16x16xbf16> to vector<16x16xf32>
    %cst = arith.constant 0.000000e+00 : f32
    %2 = vector.broadcast %cst : f32 to vector<16x16xf32>
    %3 = arith.cmpf ogt, %1, %2 : vector<16x16xf32>
    %cst_1 = arith.constant 0.000000e+00 : f32
    %cst_2 = arith.constant -1.000000e+30 : f32
    %4 = vector.broadcast %cst_1 : f32 to vector<16x16xf32>
    %5 = vector.broadcast %cst_2 : f32 to vector<16x16xf32>
    %6 = arith.select %3, %4, %5 : vector<16x16xi1>, vector<16x16xf32>
    %cst_3 = arith.constant dense<0xFF800000> : vector<16xf32>
    %7 = vector.multi_reduction <maximumf>, %1, %cst_3 [1] : vector<16x16xf32> to vector<16xf32>
    %8 = vector.shape_cast %7 : vector<16xf32> to vector<16x1xf32>
    %cst_4 = arith.constant 0.000000e+00 : f32
    %9 = vector.broadcast %cst_4 : f32 to vector<16x1xf32>
    %10 = arith.cmpf ogt, %8, %9 : vector<16x1xf32>
    %11 = arith.extui %10 : vector<16x1xi1> to vector<16x1xi32>
    %12 = arith.sitofp %11 : vector<16x1xi32> to vector<16x1xf32>
    %c0_5 = arith.constant 0 : index
    %c0_6 = arith.constant 0 : index
    %c0_7 = arith.constant 0 : index
    %13 = vector.load %arg1[%c0_5, %c0_6, %c0_7] : memref<1x16x8xbf16, #tpu.memory_space<vmem>>, vector<1x16x8xbf16>
    %14 = vector.shape_cast %13 : vector<1x16x8xbf16> to vector<16x8xbf16>
    %c0_8 = arith.constant 0 : index
    %c0_9 = arith.constant 0 : index
    %15 = vector.load %arg3[%c0_8, %c0_9] : memref<8x128xbf16, #tpu.memory_space<vmem>>, vector<8x128xbf16>
    %cst_10 = arith.constant dense<0.000000e+00> : vector<16x128xf32>
    %16 = tpu.matmul %14, %15, %cst_10 {dimension_numbers = #tpu.dot_dimension_numbers<[1], [0], [0], [1], [0, 0, 1, 1], [], []>} : vector<16x8xbf16>, vector<8x128xbf16>, vector<16x128xf32> -> vector<16x128xf32>
    %c0_11 = arith.constant 0 : index
    %c0_12 = arith.constant 0 : index
    %17 = vector.load %arg4[%c0_11, %c0_12] : memref<1x128xf32, #tpu.memory_space<vmem>>, vector<1x128xf32>
    %18 = vector.broadcast %17 : vector<1x128xf32> to vector<16x128xf32>
    %19 = arith.addf %16, %18 : vector<16x128xf32>
    %20 = vector.extract_strided_slice %19 {offsets = [0, 0], sizes = [16, 32], strides = [1, 1]} : vector<16x128xf32> to vector<16x32xf32>
    %cst_13 = arith.constant 0.176776692 : f32
    %21 = vector.broadcast %cst_13 : f32 to vector<16x32xf32>
    %22 = arith.mulf %20, %21 : vector<16x32xf32>
    %23 = arith.truncf %22 : vector<16x32xf32> to vector<16x32xbf16>
    %24 = vector.extract_strided_slice %19 {offsets = [0, 32], sizes = [16, 32], strides = [1, 1]} : vector<16x128xf32> to vector<16x32xf32>
    %25 = arith.truncf %24 : vector<16x32xf32> to vector<16x32xbf16>
    %26 = vector.extract_strided_slice %19 {offsets = [0, 64], sizes = [16, 32], strides = [1, 1]} : vector<16x128xf32> to vector<16x32xf32>
    %27 = arith.truncf %26 : vector<16x32xf32> to vector<16x32xbf16>
    %28 = vector.extract_strided_slice %19 {offsets = [0, 96], sizes = [16, 32], strides = [1, 1]} : vector<16x128xf32> to vector<16x32xf32>
    %cst_14 = arith.constant dense<0.000000e+00> : vector<16x16xf32>
    %29 = tpu.matmul %23, %25, %cst_14 {dimension_numbers = #tpu.dot_dimension_numbers<[1], [1], [0], [0], [0, 0, 1, 0], [], []>} : vector<16x32xbf16>, vector<16x32xbf16>, vector<16x16xf32> -> vector<16x16xf32>
    %30 = arith.addf %29, %6 : vector<16x16xf32>
    %cst_15 = arith.constant dense<0xFF800000> : vector<16xf32>
    %31 = vector.multi_reduction <maximumf>, %30, %cst_15 [1] : vector<16x16xf32> to vector<16xf32>
    %32 = vector.shape_cast %31 : vector<16xf32> to vector<16x1xf32>
    %33 = vector.broadcast %32 : vector<16x1xf32> to vector<16x16xf32>
    %34 = arith.subf %30, %33 : vector<16x16xf32>
    %35 = math.exp %34 : vector<16x16xf32>
    %cst_16 = arith.constant dense<0.000000e+00> : vector<16xf32>
    %36 = vector.multi_reduction <add>, %35, %cst_16 [1] : vector<16x16xf32> to vector<16xf32>
    %37 = vector.shape_cast %36 : vector<16xf32> to vector<16x1xf32>
    %38 = tpu.reciprocal %37 {approx = true} : vector<16x1xf32> -> vector<16x1xf32>
    %39 = vector.broadcast %38 : vector<16x1xf32> to vector<16x16xf32>
    %40 = arith.mulf %35, %39 : vector<16x16xf32>
    %41 = arith.truncf %40 : vector<16x16xf32> to vector<16x16xbf16>
    %cst_17 = arith.constant dense<0.000000e+00> : vector<16x32xf32>
    %42 = tpu.matmul %41, %27, %cst_17 {dimension_numbers = #tpu.dot_dimension_numbers<[1], [0], [0], [1], [0, 0, 1, 1], [], []>} : vector<16x16xbf16>, vector<16x32xbf16>, vector<16x32xf32> -> vector<16x32xf32>
    %43 = vector.broadcast %12 : vector<16x1xf32> to vector<16x32xf32>
    %44 = arith.mulf %42, %43 : vector<16x32xf32>
    %45 = arith.addf %44, %28 : vector<16x32xf32>
    %cst_18 = arith.constant 0.000000e+00 : f32
    %46 = vector.broadcast %cst_18 : f32 to vector<16x32xf32>
    %47 = arith.cmpf ogt, %45, %46 : vector<16x32xf32>
    %cst_19 = arith.constant 0.000000e+00 : f32
    %48 = vector.broadcast %cst_19 : f32 to vector<16x32xf32>
    %49 = arith.minimumf %45, %48 : vector<16x32xf32>
    %50 = math.exp %49 : vector<16x32xf32>
    %cst_20 = arith.constant 1.000000e+00 : f32
    %51 = vector.broadcast %cst_20 : f32 to vector<16x32xf32>
    %52 = arith.subf %50, %51 : vector<16x32xf32>
    %53 = arith.select %47, %45, %52 : vector<16x32xi1>, vector<16x32xf32>
    %54 = arith.truncf %53 : vector<16x32xf32> to vector<16x32xbf16>
    %c0_21 = arith.constant 0 : index
    %c0_22 = arith.constant 0 : index
    %55 = vector.load %arg5[%c0_21, %c0_22] : memref<32x128xbf16, #tpu.memory_space<vmem>>, vector<32x128xbf16>
    %cst_23 = arith.constant dense<0.000000e+00> : vector<16x128xf32>
    %56 = tpu.matmul %54, %55, %cst_23 {dimension_numbers = #tpu.dot_dimension_numbers<[1], [0], [0], [1], [0, 0, 1, 1], [], []>} : vector<16x32xbf16>, vector<32x128xbf16>, vector<16x128xf32> -> vector<16x128xf32>
    %c0_24 = arith.constant 0 : index
    %c0_25 = arith.constant 0 : index
    %57 = vector.load %arg6[%c0_24, %c0_25] : memref<1x128xf32, #tpu.memory_space<vmem>>, vector<1x128xf32>
    %58 = vector.broadcast %57 : vector<1x128xf32> to vector<16x128xf32>
    %59 = arith.addf %56, %58 : vector<16x128xf32>
    %60 = vector.extract_strided_slice %59 {offsets = [0, 0], sizes = [16, 32], strides = [1, 1]} : vector<16x128xf32> to vector<16x32xf32>
    %cst_26 = arith.constant 0.176776692 : f32
    %61 = vector.broadcast %cst_26 : f32 to vector<16x32xf32>
    %62 = arith.mulf %60, %61 : vector<16x32xf32>
    %63 = arith.truncf %62 : vector<16x32xf32> to vector<16x32xbf16>
    %64 = vector.extract_strided_slice %59 {offsets = [0, 32], sizes = [16, 32], strides = [1, 1]} : vector<16x128xf32> to vector<16x32xf32>
    %65 = arith.truncf %64 : vector<16x32xf32> to vector<16x32xbf16>
    %66 = vector.extract_strided_slice %59 {offsets = [0, 64], sizes = [16, 32], strides = [1, 1]} : vector<16x128xf32> to vector<16x32xf32>
    %67 = arith.truncf %66 : vector<16x32xf32> to vector<16x32xbf16>
    %68 = vector.extract_strided_slice %59 {offsets = [0, 96], sizes = [16, 32], strides = [1, 1]} : vector<16x128xf32> to vector<16x32xf32>
    %cst_27 = arith.constant dense<0.000000e+00> : vector<16x16xf32>
    %69 = tpu.matmul %63, %65, %cst_27 {dimension_numbers = #tpu.dot_dimension_numbers<[1], [1], [0], [0], [0, 0, 1, 0], [], []>} : vector<16x32xbf16>, vector<16x32xbf16>, vector<16x16xf32> -> vector<16x16xf32>
    %70 = arith.addf %69, %6 : vector<16x16xf32>
    %cst_28 = arith.constant dense<0xFF800000> : vector<16xf32>
    %71 = vector.multi_reduction <maximumf>, %70, %cst_28 [1] : vector<16x16xf32> to vector<16xf32>
    %72 = vector.shape_cast %71 : vector<16xf32> to vector<16x1xf32>
    %73 = vector.broadcast %72 : vector<16x1xf32> to vector<16x16xf32>
    %74 = arith.subf %70, %73 : vector<16x16xf32>
    %75 = math.exp %74 : vector<16x16xf32>
    %cst_29 = arith.constant dense<0.000000e+00> : vector<16xf32>
    %76 = vector.multi_reduction <add>, %75, %cst_29 [1] : vector<16x16xf32> to vector<16xf32>
    %77 = vector.shape_cast %76 : vector<16xf32> to vector<16x1xf32>
    %78 = tpu.reciprocal %77 {approx = true} : vector<16x1xf32> -> vector<16x1xf32>
    %79 = vector.broadcast %78 : vector<16x1xf32> to vector<16x16xf32>
    %80 = arith.mulf %75, %79 : vector<16x16xf32>
    %81 = arith.truncf %80 : vector<16x16xf32> to vector<16x16xbf16>
    %cst_30 = arith.constant dense<0.000000e+00> : vector<16x32xf32>
    %82 = tpu.matmul %81, %67, %cst_30 {dimension_numbers = #tpu.dot_dimension_numbers<[1], [0], [0], [1], [0, 0, 1, 1], [], []>} : vector<16x16xbf16>, vector<16x32xbf16>, vector<16x32xf32> -> vector<16x32xf32>
    %83 = vector.broadcast %12 : vector<16x1xf32> to vector<16x32xf32>
    %84 = arith.mulf %82, %83 : vector<16x32xf32>
    %85 = arith.addf %84, %68 : vector<16x32xf32>
    %c0_i32 = arith.constant 0 : i32
    %86 = arith.cmpi eq, %arg0, %c0_i32 : i32
    %87 = arith.select %86, %53, %85 : vector<16x32xf32>
    %88 = arith.truncf %87 : vector<16x32xf32> to vector<16x32xbf16>
    %c0_31 = arith.constant 0 : index
    %c0_32 = arith.constant 0 : index
    %89 = vector.load %arg7[%c0_31, %c0_32] : memref<32x32xbf16, #tpu.memory_space<vmem>>, vector<32x32xbf16>
    %cst_33 = arith.constant dense<0.000000e+00> : vector<16x32xf32>
    %90 = tpu.matmul %88, %89, %cst_33 {dimension_numbers = #tpu.dot_dimension_numbers<[1], [0], [0], [1], [0, 0, 1, 1], [], []>} : vector<16x32xbf16>, vector<32x32xbf16>, vector<16x32xf32> -> vector<16x32xf32>
    %c0_34 = arith.constant 0 : index
    %c0_35 = arith.constant 0 : index
    %91 = vector.load %arg8[%c0_34, %c0_35] : memref<1x32xf32, #tpu.memory_space<vmem>>, vector<1x32xf32>
    %92 = vector.broadcast %91 : vector<1x32xf32> to vector<16x32xf32>
    %93 = arith.addf %90, %92 : vector<16x32xf32>
    %94 = vector.extract_strided_slice %93 {offsets = [0, 0], sizes = [16, 8], strides = [1, 1]} : vector<16x32xf32> to vector<16x8xf32>
    %cst_36 = arith.constant 0.353553385 : f32
    %95 = vector.broadcast %cst_36 : f32 to vector<16x8xf32>
    %96 = arith.mulf %94, %95 : vector<16x8xf32>
    %97 = arith.truncf %96 : vector<16x8xf32> to vector<16x8xbf16>
    %98 = vector.extract_strided_slice %93 {offsets = [0, 8], sizes = [16, 8], strides = [1, 1]} : vector<16x32xf32> to vector<16x8xf32>
    %99 = arith.truncf %98 : vector<16x8xf32> to vector<16x8xbf16>
    %100 = vector.extract_strided_slice %93 {offsets = [0, 16], sizes = [16, 8], strides = [1, 1]} : vector<16x32xf32> to vector<16x8xf32>
    %101 = arith.truncf %100 : vector<16x8xf32> to vector<16x8xbf16>
    %102 = vector.extract_strided_slice %93 {offsets = [0, 24], sizes = [16, 8], strides = [1, 1]} : vector<16x32xf32> to vector<16x8xf32>
    %cst_37 = arith.constant dense<0.000000e+00> : vector<16x16xf32>
    %103 = tpu.matmul %97, %99, %cst_37 {dimension_numbers = #tpu.dot_dimension_numbers<[1], [1], [0], [0], [0, 0, 1, 0], [], []>} : vector<16x8xbf16>, vector<16x8xbf16>, vector<16x16xf32> -> vector<16x16xf32>
    %104 = arith.addf %103, %6 : vector<16x16xf32>
    %cst_38 = arith.constant dense<0xFF800000> : vector<16xf32>
    %105 = vector.multi_reduction <maximumf>, %104, %cst_38 [1] : vector<16x16xf32> to vector<16xf32>
    %106 = vector.shape_cast %105 : vector<16xf32> to vector<16x1xf32>
    %107 = vector.broadcast %106 : vector<16x1xf32> to vector<16x16xf32>
    %108 = arith.subf %104, %107 : vector<16x16xf32>
    %109 = math.exp %108 : vector<16x16xf32>
    %cst_39 = arith.constant dense<0.000000e+00> : vector<16xf32>
    %110 = vector.multi_reduction <add>, %109, %cst_39 [1] : vector<16x16xf32> to vector<16xf32>
    %111 = vector.shape_cast %110 : vector<16xf32> to vector<16x1xf32>
    %112 = tpu.reciprocal %111 {approx = true} : vector<16x1xf32> -> vector<16x1xf32>
    %113 = vector.broadcast %112 : vector<16x1xf32> to vector<16x16xf32>
    %114 = arith.mulf %109, %113 : vector<16x16xf32>
    %115 = arith.truncf %114 : vector<16x16xf32> to vector<16x16xbf16>
    %cst_40 = arith.constant dense<0.000000e+00> : vector<16x8xf32>
    %116 = tpu.matmul %115, %101, %cst_40 {dimension_numbers = #tpu.dot_dimension_numbers<[1], [0], [0], [1], [0, 0, 1, 1], [], []>} : vector<16x16xbf16>, vector<16x8xbf16>, vector<16x8xf32> -> vector<16x8xf32>
    %117 = vector.broadcast %12 : vector<16x1xf32> to vector<16x8xf32>
    %118 = arith.mulf %116, %117 : vector<16x8xf32>
    %119 = arith.addf %118, %102 : vector<16x8xf32>
    %cst_41 = arith.constant 0.000000e+00 : f32
    %120 = vector.broadcast %cst_41 : f32 to vector<16x88xf32>
    %121 = tpu.concatenate %85, %119, %120 in 1 : vector<16x32xf32>, vector<16x8xf32>, vector<16x88xf32> -> vector<16x128xf32>
    %c0_42 = arith.constant 0 : index
    %c0_43 = arith.constant 0 : index
    %c0_44 = arith.constant 0 : index
    %122 = vector.load %arg9[%c0_42, %c0_43, %c0_44] : memref<1x16x128xf32, #tpu.memory_space<vmem>>, vector<1x16x128xf32>
    %123 = vector.shape_cast %122 : vector<1x16x128xf32> to vector<16x128xf32>
    %124 = vector.shape_cast %121 : vector<16x128xf32> to vector<1x16x128xf32>
    tpu.vector_store %arg9[%c0_42, %c0_43, %c0_44], %124 {strides = array<i32>} : memref<1x16x128xf32, #tpu.memory_space<vmem>>, vector<1x16x128xf32>,
    return
  }
  func.func @transform_0(%arg0: i32) -> (i32, i32, i32) {
    %c0_i32 = arith.constant 0 : i32
    %c0_i32_0 = arith.constant 0 : i32
    %c0_i32_1 = arith.constant 0 : i32
    return %arg0, %c0_i32, %c0_i32_0 : i32, i32, i32
  }
  func.func @transform_1(%arg0: i32) -> (i32, i32) {
    %c0_i32 = arith.constant 0 : i32
    %c0_i32_0 = arith.constant 0 : i32
    %c0_i32_1 = arith.constant 0 : i32
    return %c0_i32, %c0_i32_0 : i32, i32
  }
  func.func @transform_2(%arg0: i32) -> (i32, i32) {
    %c0_i32 = arith.constant 0 : i32
    %c0_i32_0 = arith.constant 0 : i32
    %c0_i32_1 = arith.constant 0 : i32
    return %c0_i32, %c0_i32_0 : i32, i32
  }
  func.func @transform_3(%arg0: i32) -> (i32, i32) {
    %c0_i32 = arith.constant 0 : i32
    %c0_i32_0 = arith.constant 0 : i32
    %c0_i32_1 = arith.constant 0 : i32
    return %c0_i32, %c0_i32_0 : i32, i32
  }
  func.func @transform_4(%arg0: i32) -> (i32, i32) {
    %c0_i32 = arith.constant 0 : i32
    %c0_i32_0 = arith.constant 0 : i32
    %c0_i32_1 = arith.constant 0 : i32
    return %c0_i32, %c0_i32_0 : i32, i32
  }
  func.func @transform_5(%arg0: i32) -> (i32, i32) {
    %c0_i32 = arith.constant 0 : i32
    %c0_i32_0 = arith.constant 0 : i32
    %c0_i32_1 = arith.constant 0 : i32
    return %c0_i32, %c0_i32_0 : i32, i32
  }
  func.func @transform_6(%arg0: i32) -> (i32, i32) {
    %c0_i32 = arith.constant 0 : i32
    %c0_i32_0 = arith.constant 0 : i32
    %c0_i32_1 = arith.constant 0 : i32
    return %c0_i32, %c0_i32_0 : i32, i32
  }
  func.func @transform_7(%arg0: i32) -> (i32, i32) {
    %c0_i32 = arith.constant 0 : i32
    %c0_i32_0 = arith.constant 0 : i32
    %c0_i32_1 = arith.constant 0 : i32
    return %c0_i32, %c0_i32_0 : i32, i32
  }
  func.func @transform_8(%arg0: i32) -> (i32, i32, i32) {
    %c0_i32 = arith.constant 0 : i32
    %c0_i32_0 = arith.constant 0 : i32
    %c0_i32_1 = arith.constant 0 : i32
    return %arg0, %c0_i32, %c0_i32_0 : i32, i32, i32
  }
}

</mosaic_0001>

<bundles_post_ra>
// kernel: img_contrast_forward.1
= control target key start
LH: loop header
LB: loop body
LE: loop exit
PB: predicated region body
PF: predicated region fallthrough
CT: control target
= control target key end

     0   :  { %s1253_s27 = smov 0   ;;  %s1411_s0 = inlined_call_operand.vmem [shape: bf16[2,16,8], index: 0, kind: input, shape index: {}]   ;;  %s1412_s1 = inlined_call_operand.vmem [shape: bf16[16,16], index: 1, kind: input, shape index: {}]   ;;  %s1413_s2 = inlined_call_operand.vmem [shape: bf16[8,128], index: 2, kind: input, shape index: {}]   ;;  %s1414_s3 = inlined_call_operand.vmem [shape: f32[1,128], index: 3, kind: input, shape index: {}]   ;;  %s1415_s4 = inlined_call_operand.vmem [shape: bf16[32,128], index: 4, kind: input, shape index: {}]   ;;  %s1416_s5 = inlined_call_operand.vmem [shape: f32[1,128], index: 5, kind: input, shape index: {}]   ;;  %s1417_s6 = inlined_call_operand.vmem [shape: bf16[32,32], index: 6, kind: input, shape index: {}]   ;;  %s1418_s7 = inlined_call_operand.vmem [shape: f32[1,32], index: 7, kind: input, shape index: {}]   ;;  %s1419_s8 = inlined_call_operand.vmem [shape: f32[2,16,128], index: 8, kind: output, shape index: {}]  }
   0x1 LB: > { %s1259_s28 = sadd.s32 4294967295, %s1197_s27   ;;  %p1029_p0 = scmp.ge.s32.totalorder %s1197_s27, 1  ;;  %s1197_s27 = sphi %s1253_s27, %s18_s27  }
   0x2   : > { %p262_p1 = scmp.lt.s32.totalorder %s1197_s27, 3 }
   0x4   : > { %p263_p2 = pnand %p1029_p0, %p262_p1 }
   0x5   : > { %v330_v0 = vld [vmem:[%s1413_s2] sm:$0xf] (!%p263_p2)  ;;  %vm347_vm0 = vcmask (!%p263_p2), 1043456   ;;  %p296_p3 = scmp.lt.s32.totalorder (!%p263_p2), %s1259_s28, 1  ;;  %v1199_v1 = vmov (!%p263_p2), 0.0   ;;  %vm1200_vm1 = vmmov (!%p263_p2), 0  }
   0x6   : > { %266 = sbr.rel (%p263_p2) target bundleno = 3440 (0xd70), region = 52  ;;  %1083 = vmatprep.subr.bf16.mxu0 (!%p263_p2), %v1199_v1  ;;  %v349_v2 = vsel (!%p263_p2), %vm347_vm0, %v330_v0, 0  ;;  %1085 = vmatprep.mubr.msk.bf16.mxu0 (!%p263_p2), %vm1200_vm1, %v1199_v1  ;;  %vm343_vm2 = vcmask (!%p263_p2), 64512   ;;  %v1036_v4 = vld [vmem:[%s1414_s3] ss:$0 sm:$0xff] (!%p263_p2)  ;;  %s1201_s16 = smov (!%p263_p2), 96  }
   0x7   : > { %1084 = vmatpush3.bf16.msra.mxu0 (!%p263_p2), %v349_v2  ;;  %1089 = vmatprep.subr.bf16.mxu1 (!%p263_p2), %v1199_v1  ;;  %vm399_vm3 = vcmask (!%p263_p2), 261120   ;;  %v1060_v17 = vld [vmem:[%s1412_s1] sm:$0xff] (!%p263_p2)   ;;  %v1202_v20 = vmov (!%p263_p2), -1e+30   ;;  %vm315_vm6 = vcmask (!%p263_p2), 130048   ;;  %s1203_s19 = smov (!%p263_p2), 32  }
   0x8   : > { %1091 = vmatprep.mubr.msk.bf16.mxu1 (!%p263_p2), %vm1200_vm1, %v1199_v1  ;;  %1095 = vmatprep.subr.bf16.mxu0 (!%p263_p2), %v1199_v1  ;;  %v1061_v18 = vunpack.c.l.bf16 (!%p263_p2), %v1060_v17  ;;  %v1062_v19 = vunpack.c.h.bf16 (!%p263_p2), %v1060_v17  ;;  %s1204_s20 = smov (!%p263_p2), 64   ;;  %v1159_v51 = vld [vmem:[%s1415_s4] sm:$0xff] (!%p263_p2)   ;;  %v1160_v52 = vld [vmem:[%s1415_s4 + $0x8] sm:$0xff] (!%p263_p2)   ;;  %p745_p4 = scmp.eq.s32.totalorder (!%p263_p2), %s1259_s28, 0  ;;  %vm965_vm12 = vcmask (!%p263_p2), 326656  }
   0x9   : > { %s1205_s14 = smov (!%p263_p2), 120   ;;  %s1206_s15 = smov (!%p263_p2), 104  }
   0xa   : > { %vm311_vm4 = vcmp.gt.f32.partialorder (!%p263_p2), %v1061_v18, 0.0  ;;  %vm312_vm5 = vcmp.gt.f32.partialorder (!%p263_p2), %v1062_v19, 0.0  ;;  %v319_v31 = vsel (!%p263_p2), %vm315_vm6, %v1062_v19, -inf  ;;  %v316_v42 = vsel (!%p263_p2), %vm315_vm6, %v1061_v18, -inf }
   0xb   : > { %v1296_v21 = vsel (!%p263_p2), %vm311_vm4, 0.0, %v1202_v20  ;;  %v1298_v23 = vsel (!%p263_p2), %vm312_vm5, 0.0, %v1202_v20 }
   0xd   : > { %s1271_s9 = scalar_select %p296_p3, %s1259_s28, 1 }
   0xe   : > { %s746_s12 = scalar_select %p745_p4, 1, 0 }
   0xf   : > { %s1057_s10 = sshll.u32 %s1271_s9, 3  ;;  %s1058_s17 = sshll.u32 %s1271_s9, 4 }
  0x10   : > { %s300_s13 = scalar_lea.vmem %s1411_s0, %s1057_s10  ;;  %s305_s21 = scalar_lea.vmem %s1419_s8, %s1058_s17 }
  0x11   : > { %v1158_v3 = vld [vmem:[%s300_s13] sm:$0xff]  }
  0x12   : > { %1086 = vmatmul.mubr.msk.bf16.vlgmr.msra.gmra.mrb[0].mxu0 %vm343_vm2, %v1158_v3 }
  0x13   : > { %1097 = vmatprep.mubr.msk.bf16.mxu0 %vm1200_vm1, %v1199_v1 }
  0xe5   : > { %v385_v5 = vpop.f32.mrb[0].mxu0 }
  0xe6   : > { %v1087_v6 = vpop.f32.mrb[1].mxu0  ;;  %v386_v8 = vadd.f32 %v1036_v4, %v385_v5 }
  0xe7   : > { %v388_v7 = vpop.f32.mrb[2].mxu0 }
  0xe8   : > { %v389_v9 = vadd.f32 %v1036_v4, %v388_v7  ;;  %v1088_v10 = vpop.f32.mrb[3].mxu0  ;;  %v392_v15 = vmul.f32 0.17677669, %v386_v8 }
  0xea   : > { %v395_v11 = vpack.c.bf16 %v389_v9, %v386_v8  ;;  %v393_v14 = vmul.f32 0.17677669, %v389_v9 }
  0xec   : > { %397 = vrot.lane.b32.xlu0 %v395_v11, %s1201_s16  ;;  %v394_v16 = vpack.c.bf16 %v393_v14, %v392_v15  ;;  %v1043_v15 = vld [vmem:[%s1416_s5] ss:$0 sm:$0xff] }
 0x15e   : > { %v398_v12 = vpop.permute.xlu0 %397 }
 0x15f   : > { %v404_v13 = vsel %vm399_vm3, %v398_v12, 0 }
 0x160   : > { %1090 = vmatpush3.bf16.xpose.msra.mxu1 %v404_v13 }
 0x161   : > { %1101 = vmatprep.subr.bf16.mxu1 %v1199_v1 }
 0x167   : > { %1092 = vmatmul.mubr.msk.bf16.vlgmr.msra.gmra.mrb[0].mxu1 %vm399_vm3, %v394_v16 }
 0x168   : > { %1105 = vmatprep.mubr.msk.bf16.mxu1 %vm1200_vm1, %v1199_v1  ;;  %1102 = vmatpush3.bf16.msra.mxu1 %v1159_v51 }
 0x169   : > { %1103 = vmatprep.subr.bf16.mxu1 %v1199_v1 }
 0x16c   : > { %1104 = vmatpush3.bf16.msra.mxu1 %v1160_v52 }
 0x16d   : > { %1115 = vmatprep.subr.bf16.mxu1 %v1199_v1 }
 0x23a   : > { %v440_v22 = vpop.f32.mrb[0].mxu1 }
 0x23b   : > { %v441_v24 = vadd.f32 %v440_v22, %v1296_v21  ;;  %v1093_v25 = vpop.f32.mrb[1].mxu1 }
 0x23c   : > { %v443_v26 = vpop.f32.mrb[2].mxu1 }
 0x23d   : > { %v444_v27 = vadd.f32 %v443_v26, %v1298_v23  ;;  %v1094_v28 = vpop.f32.mrb[3].mxu1  ;;  %v447_v29 = vsel %vm315_vm6, %v441_v24, -inf }
 0x23e   : > { %448 = vmax.xlane.f32.xlu0 %v447_v29 }
 0x23f   : > { %v450_v30 = vsel %vm315_vm6, %v444_v27, -inf }
 0x240   : > { %451 = vmax.xlane.f32.xlu1 %v450_v30 }
 0x242   : > { %320 = vmax.xlane.f32.xlu0 %v319_v31 }
 0x258   : > { %521 = vrot.lane.b32.xlu0 %v386_v8, %s1203_s19 }
 0x25c   : > { %523 = vrot.lane.b32.xlu0 %v389_v9, %s1203_s19 }
 0x2cb   : > { %v449_v32 = vpop.xlane.xlu0 %448 }
 0x2cc   : > { %v453_v33 = vsub.f32 %v441_v24, %v449_v32 }
 0x2cd   : > { %v452_v34 = vpop.xlane.xlu1 %451 }
 0x2ce   : > { %v455_v35 = vmul.f32 1.442695, %v453_v33  ;;  %v454_v36 = vsub.f32 %v444_v27, %v452_v34 }
 0x2cf   : > { %v321_v53 = vpop.xlane.xlu0 %320 }
 0x2d0   : > { %1163 = vpow2.f32 %v455_v35  ;;  %v457_v37 = vmul.f32 1.442695, %v454_v36  ;;  %vm323_vm8 = vcmp.gt.f32.partialorder %v321_v53, 0.0 }
 0x2d1   : > { %v1328_v60 = vsel %vm323_vm8, 1.0, %v1199_v1 }
 0x2d2   : > { %1165 = vpow2.f32 %v457_v37 }
 0x2d3   : > { %v522_v55 = vpop.permute.xlu0 %521 }
 0x2d7   : > { %v524_v2 = vpop.permute.xlu0 %523 }
 0x2da   : > { %v1164_v38 = vpop.eup %1163 }
 0x2db   : > { %v459_v39 = vsel %vm315_vm6, %v1164_v38, 0.0 }
 0x2dc   : > { %v1166_v40 = vpop.eup %1165  ;;  %460 = vadd.xlane.f32.xlu1 %v459_v39 }
 0x2dd   : > { %v462_v41 = vsel %vm315_vm6, %v1166_v40, 0.0 }
 0x2e0   : > { %463 = vadd.xlane.f32.xlu1 %v462_v41 }
 0x2f1   : > { %470 = vrot.lane.b32.xlu1 %v395_v11, %s1204_s20 }
 0x315   : > { %317 = vmax.xlane.f32.xlu1 %v316_v42 }
 0x369   : > { %v461_v43 = vpop.xlane.xlu1 %460 }
 0x36a   : > { %1167 = vrcp.f32 %v461_v43 }
 0x36d   : > { %v464_v44 = vpop.xlane.xlu1 %463 }
 0x36e   : > { %1169 = vrcp.f32 %v464_v44 }
 0x371   : > { %v471_v45 = vpop.permute.xlu1 %470 }
 0x372   : > { %1096 = vmatpush3.bf16.msra.mxu0 %v471_v45 }
 0x373   : > { %1109 = vmatprep.subr.bf16.mxu0 %v1199_v1 }
 0x374   : > { %v1168_v46 = vpop.eup %1167 }
 0x375   : > { %v467_v48 = vmul.f32 %v1168_v46, %v1164_v38 }
 0x378   : > { %v1170_v47 = vpop.eup %1169 }
 0x379   : > { %v468_v49 = vmul.f32 %v1170_v47, %v1166_v40 }
 0x37b   : > { %v469_v50 = vpack.c.bf16 %v468_v49, %v467_v48 }
 0x37d   : > { %1098 = vmatmul.mubr.msk.bf16.vlgmr.msra.gmra.mrb[4].mxu0 %vm315_vm6, %v469_v50 }
 0x37e   : > { %1111 = vmatprep.mubr.msk.bf16.mxu0 %vm1200_vm1, %v1199_v1 }
 0x3a2   : > { %v318_v54 = vpop.xlane.xlu1 %317 }
 0x3a3   : > { %vm322_vm7 = vcmp.gt.f32.partialorder %v318_v54, 0.0 }
 0x3a4   : > { %v1324_v56 = vsel %vm322_vm7, 1.0, %v1199_v1 }
 0x450   : > { %v510_v57 = vpop.f32.mrb[4].mxu0 }
 0x451   : > { %v517_v58 = vmul.f32 %v1324_v56, %v510_v57  ;;  %v1099_v59 = vpop.f32.mrb[5].mxu0  ;;  %v1161_v57 = vld [vmem:[%s1417_s6] sm:$0xff]  }
 0x452   : > { %v513_v61 = vpop.f32.mrb[6].mxu0 }
 0x453   : > { %v527_v62 = vadd.f32 %v522_v55, %v517_v58  ;;  %v518_v63 = vmul.f32 %v1328_v60, %v513_v61  ;;  %v1100_v0 = vpop.f32.mrb[7].mxu0  ;;  %v1162_v58 = vld [vmem:[%s1417_s6 + $0x8] sm:$0xff]  }
 0x455   : > { %v531_v3 = vmin.f32 %v527_v62, 0.0  ;;  %v528_v4 = vadd.f32 %v524_v2, %v518_v63  ;;  %vm529_vm9 = vcmp.gt.f32.partialorder %v527_v62, 0.0  ;;  %v747_v63 = vstv %s746_s12 }
 0x456   : > { %vm748_vm11 = vcmp.eq.s32.totalorder %v747_v63, 1 }
 0x457   : > { %v533_v5 = vmul.f32 1.442695, %v531_v3  ;;  %v532_v6 = vmin.f32 %v528_v4, 0.0  ;;  %vm530_vm10 = vcmp.gt.f32.partialorder %v528_v4, 0.0 }
 0x459   : > { %1171 = vpow2.f32 %v533_v5  ;;  %v535_v7 = vmul.f32 1.442695, %v532_v6 }
 0x45b   : > { %1173 = vpow2.f32 %v535_v7 }
 0x463   : > { %v1172_v8 = vpop.eup %1171 }
 0x464   : > { %v1041_v9 = vadd.f32 -1.0, %v1172_v8 }
 0x465   : > { %v1174_v10 = vpop.eup %1173 }
 0x466   : > { %v1042_v11 = vadd.f32 -1.0, %v1174_v10  ;;  %v1331_v12 = vsel %vm529_vm9, %v527_v62, %v1041_v9 }
 0x468   : > { %v1333_v13 = vsel %vm530_vm10, %v528_v4, %v1042_v11  ;;  %v1049_v11 = vld [vmem:[%s1418_s7] ss:$0 sm:$0xff] }
 0x469   : > { %v541_v14 = vpack.c.bf16 %v1333_v13, %v1331_v12 }
 0x46b   : > { %1106 = vmatmul.mubr.msk.bf16.vlgmr.msra.gmra.mrb[4].mxu1 %vm399_vm3, %v541_v14 }
 0x46c   : > { %1117 = vmatprep.mubr.msk.bf16.mxu1 %vm1200_vm1, %v1199_v1 }
 0x53e   : > { %v602_v16 = vpop.f32.mrb[4].mxu1 }
 0x53f   : > { %v1107_v17 = vpop.f32.mrb[5].mxu1  ;;  %v603_v19 = vadd.f32 %v1043_v15, %v602_v16 }
 0x540   : > { %v605_v18 = vpop.f32.mrb[6].mxu1 }
 0x541   : > { %v606_v20 = vadd.f32 %v1043_v15, %v605_v18  ;;  %v1108_v22 = vpop.f32.mrb[7].mxu1  ;;  %v609_v28 = vmul.f32 0.17677669, %v603_v19 }
 0x543   : > { %v612_v24 = vpack.c.bf16 %v606_v20, %v603_v19  ;;  %v610_v27 = vmul.f32 0.17677669, %v606_v20 }
 0x545   : > { %614 = vrot.lane.b32.xlu0 %v612_v24, %s1201_s16  ;;  %v611_v29 = vpack.c.bf16 %v610_v27, %v609_v28  ;;  %s1207_s16 = smov 112  }
 0x5b7   : > { %v615_v25 = vpop.permute.xlu0 %614 }
 0x5b8   : > { %v620_v26 = vsel %vm399_vm3, %v615_v25, 0 }
 0x5b9   : > { %1110 = vmatpush3.bf16.xpose.msra.mxu0 %v620_v26 }
 0x5ba   : > { %1121 = vmatprep.subr.bf16.mxu0 %v1199_v1 }
 0x5c0   : > { %1112 = vmatmul.mubr.msk.bf16.vlgmr.msra.gmra.mrb[8].mxu0 %vm399_vm3, %v611_v29 }
 0x5c1   : > { %1125 = vmatprep.mubr.msk.bf16.mxu0 %vm1200_vm1, %v1199_v1  ;;  %1122 = vmatpush3.bf16.msra.mxu0 %v1161_v57 }
 0x5c2   : > { %1123 = vmatprep.subr.bf16.mxu0 %v1199_v1 }
 0x5c5   : > { %1124 = vmatpush3.bf16.msra.mxu0 %v1162_v58 }
 0x5c6   : > { %1135 = vmatprep.subr.bf16.mxu0 %v1199_v1 }
 0x693   : > { %v656_v30 = vpop.f32.mrb[8].mxu0 }
 0x694   : > { %v657_v31 = vadd.f32 %v656_v30, %v1296_v21  ;;  %v1113_v32 = vpop.f32.mrb[9].mxu0 }
 0x695   : > { %v659_v33 = vpop.f32.mrb[10].mxu0 }
 0x696   : > { %v660_v34 = vadd.f32 %v659_v33, %v1298_v23  ;;  %v1114_v35 = vpop.f32.mrb[11].mxu0  ;;  %v663_v36 = vsel %vm315_vm6, %v657_v31, -inf }
 0x697   : > { %664 = vmax.xlane.f32.xlu1 %v663_v36 }
 0x698   : > { %v666_v37 = vsel %vm315_vm6, %v660_v34, -inf }
 0x699   : > { %667 = vmax.xlane.f32.xlu0 %v666_v37 }
 0x724   : > { %v665_v38 = vpop.xlane.xlu1 %664 }
 0x725   : > { %v669_v39 = vsub.f32 %v657_v31, %v665_v38 }
 0x726   : > { %v668_v40 = vpop.xlane.xlu0 %667 }
 0x727   : > { %v671_v41 = vmul.f32 1.442695, %v669_v39  ;;  %v670_v42 = vsub.f32 %v660_v34, %v668_v40 }
 0x729   : > { %1175 = vpow2.f32 %v671_v41  ;;  %v673_v43 = vmul.f32 1.442695, %v670_v42 }
 0x72b   : > { %1177 = vpow2.f32 %v673_v43 }
 0x733   : > { %v1176_v44 = vpop.eup %1175 }
 0x734   : > { %v675_v45 = vsel %vm315_vm6, %v1176_v44, 0.0 }
 0x735   : > { %v1178_v46 = vpop.eup %1177  ;;  %676 = vadd.xlane.f32.xlu1 %v675_v45 }
 0x736   : > { %v678_v47 = vsel %vm315_vm6, %v1178_v46, 0.0 }
 0x739   : > { %679 = vadd.xlane.f32.xlu1 %v678_v47 }
 0x74a   : > { %686 = vrot.lane.b32.xlu1 %v612_v24, %s1204_s20 }
 0x74e   : > { %737 = vrot.lane.b32.xlu1 %v603_v19, %s1203_s19 }
 0x752   : > { %739 = vrot.lane.b32.xlu1 %v606_v20, %s1203_s19 }
 0x7c2   : > { %v677_v48 = vpop.xlane.xlu1 %676 }
 0x7c3   : > { %1179 = vrcp.f32 %v677_v48 }
 0x7c6   : > { %v680_v49 = vpop.xlane.xlu1 %679 }
 0x7c7   : > { %1181 = vrcp.f32 %v680_v49 }
 0x7ca   : > { %v687_v50 = vpop.permute.xlu1 %686 }
 0x7cb   : > { %1116 = vmatpush3.bf16.msra.mxu1 %v687_v50 }
 0x7cc   : > { %1129 = vmatprep.subr.bf16.mxu1 %v1199_v1 }
 0x7cd   : > { %v1180_v51 = vpop.eup %1179 }
 0x7ce   : > { %v683_v53 = vmul.f32 %v1180_v51, %v1176_v44  ;;  %v738_v59 = vpop.permute.xlu1 %737 }
 0x7d1   : > { %v1182_v52 = vpop.eup %1181 }
 0x7d2   : > { %v684_v54 = vmul.f32 %v1182_v52, %v1178_v46  ;;  %v740_v6 = vpop.permute.xlu1 %739 }
 0x7d4   : > { %v685_v55 = vpack.c.bf16 %v684_v54, %v683_v53 }
 0x7d6   : > { %1118 = vmatmul.mubr.msk.bf16.vlgmr.msra.gmra.mrb[8].mxu1 %vm315_vm6, %v685_v55 }
 0x7d7   : > { %1131 = vmatprep.mubr.msk.bf16.mxu1 %vm1200_vm1, %v1199_v1 }
 0x8a9   : > { %v726_v61 = vpop.f32.mrb[8].mxu1 }
 0x8aa   : > { %v733_v62 = vmul.f32 %v1324_v56, %v726_v61  ;;  %v1119_v0 = vpop.f32.mrb[9].mxu1 }
 0x8ab   : > { %v729_v2 = vpop.f32.mrb[10].mxu1 }
 0x8ac   : > { %v1372_v3 = vadd.f32 %v738_v59, %v733_v62  ;;  %v734_v4 = vmul.f32 %v1328_v60, %v729_v2  ;;  %v1120_v5 = vpop.f32.mrb[11].mxu1 }
 0x8ae   : > { %v1375_v7 = vadd.f32 %v740_v6, %v734_v4  ;;  %v749_v8 = vsel %vm748_vm11, %v1331_v12, %v1372_v3 }
 0x8b0   : > { %v750_v9 = vsel %vm748_vm11, %v1333_v13, %v1375_v7 }
 0x8b1   : > { %v751_v10 = vpack.c.bf16 %v750_v9, %v749_v8 }
 0x8b3   : > { %1126 = vmatmul.mubr.msk.bf16.vlgmr.msra.gmra.mrb[12].mxu0 %vm399_vm3, %v751_v10 }
 0x8b4   : > { %1137 = vmatprep.mubr.msk.bf16.mxu0 %vm1200_vm1, %v1199_v1 }
 0x986   : > { %v812_v14 = vpop.f32.mrb[12].mxu0 }
 0x987   : > { %v1127_v15 = vpop.f32.mrb[13].mxu0  ;;  %v813_v17 = vadd.f32 %v1049_v11, %v812_v14 }
 0x988   : > { %v815_v16 = vpop.f32.mrb[14].mxu0 }
 0x989   : > { %v816_v18 = vadd.f32 %v1049_v11, %v815_v16  ;;  %v1128_v19 = vpop.f32.mrb[15].mxu0  ;;  %v819_v24 = vmul.f32 0.35355338, %v813_v17 }
 0x98b   : > { %v822_v12 = vpack.c.bf16 %v816_v18, %v813_v17  ;;  %v820_v22 = vmul.f32 0.35355338, %v816_v18 }
 0x98d   : > { %824 = vrot.lane.b32.xlu0 %v822_v12, %s1205_s14  ;;  %v821_v1 = vpack.c.bf16 %v820_v22, %v819_v24 }
 0x9ff   : > { %v825_v13 = vpop.permute.xlu0 %824 }
 0xa00   : > { %v830_v20 = vsel %vm343_vm2, %v825_v13, 0 }
 0xa01   : > { %1130 = vmatpush3.bf16.xpose.msra.mxu1 %v830_v20 }
 0xa08   : > { %1132 = vmatmul.mubr.msk.bf16.vlgmr.msra.gmra.mrb[12].mxu1 %vm343_vm2, %v821_v1 }
 0xadb   : > { %v866_v25 = vpop.f32.mrb[12].mxu1 }
 0xadc   : > { %v867_v26 = vadd.f32 %v866_v25, %v1296_v21  ;;  %v1133_v27 = vpop.f32.mrb[13].mxu1 }
 0xadd   : > { %v869_v28 = vpop.f32.mrb[14].mxu1 }
 0xade   : > { %v870_v29 = vadd.f32 %v869_v28, %v1298_v23  ;;  %v1134_v30 = vpop.f32.mrb[15].mxu1  ;;  %v873_v31 = vsel %vm315_vm6, %v867_v26, -inf }
 0xadf   : > { %874 = vmax.xlane.f32.xlu1 %v873_v31 }
 0xae0   : > { %v876_v32 = vsel %vm315_vm6, %v870_v29, -inf }
 0xae1   : > { %877 = vmax.xlane.f32.xlu0 %v876_v32 }
 0xaf7   : > { %947 = vrot.lane.b32.xlu0 %v813_v17, %s1206_s15 }
 0xb6c   : > { %v875_v33 = vpop.xlane.xlu1 %874 }
 0xb6d   : > { %v879_v34 = vsub.f32 %v867_v26, %v875_v33 }
 0xb6e   : > { %v878_v35 = vpop.xlane.xlu0 %877 }
 0xb6f   : > { %v881_v36 = vmul.f32 1.442695, %v879_v34  ;;  %v880_v37 = vsub.f32 %v870_v29, %v878_v35 }
 0xb71   : > { %1183 = vpow2.f32 %v881_v36  ;;  %v883_v21 = vmul.f32 1.442695, %v880_v37 }
 0xb72   : > { %v948_v52 = vpop.permute.xlu0 %947 }
 0xb73   : > { %1185 = vpow2.f32 %v883_v21 }
 0xb7b   : > { %v1184_v38 = vpop.eup %1183 }
 0xb7c   : > { %v885_v23 = vsel %vm315_vm6, %v1184_v38, 0.0 }
 0xb7d   : > { %v1186_v39 = vpop.eup %1185  ;;  %886 = vadd.xlane.f32.xlu1 %v885_v23 }
 0xb7e   : > { %v888_v40 = vsel %vm315_vm6, %v1186_v39, 0.0 }
 0xb81   : > { %889 = vadd.xlane.f32.xlu1 %v888_v40 }
 0xb92   : > { %896 = vrot.lane.b32.xlu1 %v822_v12, %s1207_s16 }
 0xb96   : > { %949 = vrot.lane.b32.xlu1 %v816_v18, %s1206_s15 }
 0xc0a   : > { %v887_v41 = vpop.xlane.xlu1 %886 }
 0xc0b   : > { %1187 = vrcp.f32 %v887_v41 }
 0xc0e   : > { %v890_v42 = vpop.xlane.xlu1 %889 }
 0xc0f   : > { %1189 = vrcp.f32 %v890_v42 }
 0xc12   : > { %v897_v43 = vpop.permute.xlu1 %896 }
 0xc13   : > { %1136 = vmatpush3.bf16.msra.mxu0 %v897_v43 }
 0xc15   : > { %v1188_v44 = vpop.eup %1187 }
 0xc16   : > { %v893_v46 = vmul.f32 %v1188_v44, %v1184_v38  ;;  %v950_v58 = vpop.permute.xlu1 %949 }
 0xc19   : > { %v1190_v45 = vpop.eup %1189 }
 0xc1a   : > { %v894_v47 = vmul.f32 %v1190_v45, %v1186_v39 }
 0xc1c   : > { %v895_v48 = vpack.c.bf16 %v894_v47, %v893_v46 }
 0xc1e   : > { %1138 = vmatmul.mubr.msk.bf16.vlgmr.msra.gmra.mrb[16].mxu0 %vm315_vm6, %v895_v48 }
 0xcf1   : > { %v936_v49 = vpop.f32.mrb[16].mxu0 }
 0xcf2   : > { %v943_v50 = vmul.f32 %v1324_v56, %v936_v49  ;;  %v1139_v51 = vpop.f32.mrb[17].mxu0 }
 0xcf3   : > { %v939_v53 = vpop.f32.mrb[18].mxu0 }
 0xcf4   : > { %v953_v54 = vadd.f32 %v948_v52, %v943_v50  ;;  %v944_v55 = vmul.f32 %v1328_v60, %v939_v53  ;;  %v1140_v57 = vpop.f32.mrb[19].mxu0 }
 0xcf6   : > { %957 = vrot.lane.b32.xlu1 %v953_v54, %s1203_s19  ;;  %v954_v59 = vadd.f32 %v950_v58, %v944_v55 }
 0xcfa   : > { %959 = vrot.lane.b32.xlu1 %v954_v59, %s1203_s19 }
 0xd68   : > { %v958_v56 = vpop.permute.xlu1 %957 }
 0xd69   : > { %v963_v61 = vsel %vm399_vm3, %v1372_v3, %v958_v56 }
 0xd6a   : > { %v966_v62 = vsel %vm965_vm12, %v963_v61, 0.0 }
 0xd6b   : > { %968 = vst [vmem:[%s305_s21] sm:$0xff] %v966_v62 }
 0xd6c   : > { %v960_v60 = vpop.permute.xlu1 %959 }
 0xd6d   : > { %v964_v63 = vsel %vm399_vm3, %v1375_v7, %v960_v60 }
 0xd6e   : > { %v967_v0 = vsel %vm965_vm12, %v964_v63, 0.0 }
 0xd6f   : > { %969 = vst [vmem:[%s305_s21 + $0x8] sm:$0xff] %v967_v0 }
 0xd70 PF: > { %s18_s27 = sadd.s32 1, %s1197_s27  }
 0xd71   : > { %p15_p5 = scmp.ge.s32.totalorder %s18_s27, 4  }
 0xd73   :  { %17 = sbr.rel (!%p15_p5) target bundleno = 1 (0x1), region = 82 }

</bundles_post_ra>
